<compile_context>
chip_gen: v5e
topology: v5e:2x2
jax: 0.10.0
libtpu: 0.0.40
codegen_flags: <defaults>
</compile_context>

<pallas_src>
import functools

import jax
import jax.numpy as jnp
from jax.experimental import pallas as pl
from jax.experimental.pallas import tpu as pltpu


LN_EPS = 0.001
ATT_EPS = 0.0001


def _gcn_fused_kernel(h_ref, adjn_ref, wt_ref, b_ref, g_ref, bt_ref,
                      o_ref, x_ref, *, batch_block, seq_len, store_all,
                      compute_dtype):
    # h_ref:    (Bb*S, H)   initial hidden state (read only at layer 0)
    # adjn_ref: (Bb, S, S)  pre-normalized adjacency, compute_dtype, resident
    #                       across the layer axis
    # wt_ref:   (1, H, H)   W^T for the current layer, compute_dtype
    # b_ref / g_ref / bt_ref: (1, 1, H) linear bias / LN gain / LN bias (f32)
    # o_ref:    output block
    # x_ref:    (Bb*S, H) f32 VMEM scratch -- hidden-state carry across layers
    layer = pl.program_id(1)
    n_layers = pl.num_programs(1)

    @pl.when(layer == 0)
    def _():
        x_ref[...] = h_ref[...].astype(jnp.float32)

    x = x_ref[...]                                  # (Bb*S, H) f32
    wt = wt_ref[0]                                  # (H, H)   compute_dtype
    bias = b_ref[0]                                 # (1, H)   f32
    gamma = g_ref[0]                                # (1, H)   f32
    beta = bt_ref[0]                                # (1, H)   f32

    # nn.Linear over all packed batch elements at once (big-M MXU pass).
    hw = jnp.dot(x.astype(compute_dtype), wt,
                 preferred_element_type=jnp.float32) + bias     # (Bb*S, H) f32

    hdim = hw.shape[-1]

    # Batched adjacency contraction: one MXU-driven batched dot instead of a
    # Python-unrolled loop of tiny 2-D dots. Row-normalization was already
    # folded into adjn in the wrapper.
    hw3d = hw.reshape(batch_block, seq_len, hdim)
    ctx = jnp.einsum("bst,bth->bsh", adjn_ref[...], hw3d.astype(compute_dtype),
                     preferred_element_type=jnp.float32)
    ctx = ctx.reshape(batch_block * seq_len, hdim)              # (Bb*S, H) f32

    # LayerNorm with torch.std semantics (unbiased, eps added to the std),
    # applied slab-wide. PyTorch's LayerNormalization short-circuits H == 1.
    if hdim > 1:
        mu = jnp.mean(ctx, axis=-1, keepdims=True)
        diff = ctx - mu
        var_u = jnp.sum(diff * diff, axis=-1, keepdims=True) * (1.0 / (hdim - 1))
        inv_std = pl.reciprocal(jnp.sqrt(var_u) + LN_EPS)       # exact recip
        ln = diff * inv_std * gamma + beta
    else:
        ln = ctx

    # ReLU; store into the carry.
    x_ref[...] = jnp.maximum(ln, 0.0)

    if store_all:
        # Per-layer output block (index depends on the layer axis).
        o_ref[0] = x_ref[...].astype(o_ref.dtype)
    else:
        # Output block is resident across the layer axis; write once at the end.
        @pl.when(layer == n_layers - 1)
        def _():
            o_ref[...] = x_ref[...].astype(o_ref.dtype)


def _vmem_limit_bytes():
    """Per-generation VMEM limit: ~75% of physical (96 MiB on v5e/v6e 128 MiB,
    48 MiB on v7x 64 MiB), capped at 100 MiB."""
    cap = 64 * 1024 * 1024
    try:
        info = pltpu.get_tpu_info()
        cap = int(getattr(info, "vmem_capacity_bytes", cap))
    except Exception:
        pass
    return min(int(cap * 0.75), 100 * 1024 * 1024)


def _choose_batch_block(batch, seq, hidden, vmem_budget, compute_itemsize,
                        target_rows=1024):
    """Largest divisor Bb of `batch` whose (Bb*seq) row block is sublane-aligned
    (multiple of 8, or the full array), at most `target_rows` rows, and whose
    resident VMEM set fits the budget. Prefers B//Bb >= 2 so the parallel batch
    axis can shard across two TensorCores on v7x."""
    candidates = [d for d in range(1, batch + 1)
                  if batch % d == 0 and ((d * seq) % 8 == 0 or d == batch)]
    if not candidates:
        return batch

    def vmem_use(d):
        rows = d * seq
        adj = 2 * d * seq * seq * compute_itemsize        # double-buffered adj
        hid = 2 * rows * hidden * 4                       # double-buffered hidden
        wts = 2 * hidden * hidden * compute_itemsize      # double-buffered weight
        carry = rows * hidden * 4                         # f32 carry scratch
        outb = 2 * rows * hidden * 4                      # output block
        return adj + hid + wts + carry + outb

    ok = [d for d in candidates
          if d * seq <= target_rows and vmem_use(d) <= vmem_budget]
    if not ok:
        ok = [min(candidates)]
    two_step = [d for d in ok if batch // d >= 2]
    pool = two_step if two_step else ok
    return max(pool)


def gcn_module(hidden, adj, params, output_all_layers=False,
               compute_dtype=jnp.float32):
    """GCNModule forward. hidden: [B,S,H], adj: [B,S,S].

    params: list of (W, b, gamma, beta) per layer.
    compute_dtype: dtype fed to the MXU (jnp.bfloat16 is an option on v6e/v7x;
    accumulation is always f32, LN/ReLU epilogue stays f32).
    """
    B, S, H = hidden.shape
    L = len(params)

    vmem_limit = _vmem_limit_bytes()
    compute_itemsize = jnp.dtype(compute_dtype).itemsize
    Bb = _choose_batch_block(B, S, H, int(vmem_limit * 0.7), compute_itemsize)

    # Layer-invariant attention normalization folded into the adjacency, once.
    row_sum = jnp.sum(adj.astype(jnp.float32), axis=-1, keepdims=True)
    adj_norm = (adj.astype(jnp.float32) / (row_sum + ATT_EPS)).astype(compute_dtype)

    # Stack per-layer parameters so one kernel indexes them via the layer axis.
    wts = jnp.stack([w.T for (w, _, _, _) in params]).astype(compute_dtype)    # (L,H,H)
    bs = jnp.stack([b for (_, b, _, _) in params]).reshape(L, 1, H).astype(jnp.float32)
    gs = jnp.stack([g for (_, _, g, _) in params]).reshape(L, 1, H).astype(jnp.float32)
    bts = jnp.stack([be for (_, _, _, be) in params]).reshape(L, 1, H).astype(jnp.float32)

    hidden2d = hidden.reshape(B * S, H)

    # TODO(synk): for production H < 128, pack the H axes of several batch
    # elements into the lane dimension (or pad H to 128 with masked LN stats)
    # to avoid masked vst.msk stores; not done here to keep exact semantics.

    kernel = functools.partial(
        _gcn_fused_kernel,
        batch_block=Bb, seq_len=S,
        store_all=output_all_layers,
        compute_dtype=compute_dtype)

    if output_all_layers:
        out_shape = jax.ShapeDtypeStruct((L, B * S, H), hidden.dtype)
        out_spec = pl.BlockSpec((1, Bb * S, H), lambda bi, l: (l, bi, 0))
    else:
        out_shape = jax.ShapeDtypeStruct((B * S, H), hidden.dtype)
        out_spec = pl.BlockSpec((Bb * S, H), lambda bi, l: (bi, 0))

    out = pl.pallas_call(
        kernel,
        out_shape=out_shape,
        grid_spec=pltpu.PrefetchScalarGridSpec(
            num_scalar_prefetch=0,
            grid=(B // Bb, L),              # layer axis innermost (carry axis)
            in_specs=[
                pl.BlockSpec((Bb * S, H), lambda bi, l: (bi, 0)),     # hidden
                pl.BlockSpec((Bb, S, S), lambda bi, l: (bi, 0, 0)),   # adj_norm
                pl.BlockSpec((1, H, H), lambda bi, l: (l, 0, 0)),     # W^T
                pl.BlockSpec((1, 1, H), lambda bi, l: (l, 0, 0)),     # bias
                pl.BlockSpec((1, 1, H), lambda bi, l: (l, 0, 0)),     # gamma
                pl.BlockSpec((1, 1, H), lambda bi, l: (l, 0, 0)),     # beta
            ],
            out_specs=out_spec,
            scratch_shapes=[pltpu.VMEM((Bb * S, H), jnp.float32)],    # carry
        ),
        compiler_params=pltpu.CompilerParams(
            dimension_semantics=("parallel", "arbitrary"),
            vmem_limit_bytes=vmem_limit),
    )(hidden2d, adj_norm, wts, bs, gs, bts)

    if output_all_layers:
        out = out.reshape(L, B, S, H)
        return [out[i] for i in range(L)]
    return out.reshape(B, S, H)


def init_gcn_params(key, layer_number, hidden_size):
    """Deterministic params matching GCNModule(layer_number, hidden_size)."""
    params = []
    bound = 1.0 / (hidden_size ** 0.5)
    for i in range(layer_number):
        kw, kb = jax.random.split(jax.random.fold_in(key, i))
        w = jax.random.uniform(kw, (hidden_size, hidden_size),
                               jnp.float32, -bound, bound)
        b = jax.random.uniform(kb, (hidden_size,), jnp.float32, -bound, bound)
        gamma = jnp.ones((hidden_size,), jnp.float32)    # a_2
        beta = jnp.zeros((hidden_size,), jnp.float32)    # b_2
        params.append((w, b, gamma, beta))
    return params


# ---------------- pure-JAX reference (silent correctness check) --------------
def _ref_module(hidden, adj, params):
    for (w, b, g, be) in params:
        row_sum = jnp.sum(adj, axis=2, keepdims=True)
        att = adj / (row_sum + ATT_EPS)
        hw = jnp.einsum("bsh,oh->bso", hidden, w) + b
        ctx = jnp.einsum("bst,bth->bsh", att, hw)
        H = ctx.shape[-1]
        mu = jnp.mean(ctx, axis=-1, keepdims=True)
        diff = ctx - mu
        std = jnp.sqrt(jnp.sum(diff * diff, axis=-1, keepdims=True) / (H - 1))
        ln = diff / (std + LN_EPS) * g + be
        hidden = jnp.maximum(ln, 0.0)
    return hidden


if __name__ == "__main__":
    B, S, H = 2, 8, 32
    LAYERS = 2

    key = jax.random.PRNGKey(0)
    k_h, k_a, k_p = jax.random.split(key, 3)

    hidden = jax.random.normal(k_h, (B, S, H), jnp.float32)
    # random 0/1 adjacency with self loops (so rows are non-empty)
    adj = (jax.random.uniform(k_a, (B, S, S)) > 0.5).astype(jnp.float32)
    adj = jnp.maximum(adj, jnp.eye(S, dtype=jnp.float32)[None])

    params = init_gcn_params(k_p, LAYERS, H)

    out = gcn_module(hidden, adj, params, output_all_layers=False)
    out = jax.block_until_ready(out)

    ref = _ref_module(hidden, adj, params)
    assert out.shape == (B, S, H)
    assert jnp.allclose(out, ref, atol=1e-4, rtol=1e-4), "mismatch vs reference"

    print("KERNEL_OK")
</pallas_src>

<mosaic_0001>
module attributes {stable_mosaic.version = 11 : i64} {
  func.func @_gcn_fused_kernel(%arg0: i32, %arg1: i32, %arg2: memref<8x32xf32, #tpu.memory_space<vmem>>, %arg3: memref<1x8x8xf32, #tpu.memory_space<vmem>>, %arg4: memref<1x32x32xf32, #tpu.memory_space<vmem>>, %arg5: memref<1x1x32xf32, #tpu.memory_space<vmem>>, %arg6: memref<1x1x32xf32, #tpu.memory_space<vmem>>, %arg7: memref<1x1x32xf32, #tpu.memory_space<vmem>>, %arg8: memref<8x32xf32, #tpu.memory_space<vmem>>, %arg9: memref<8x32xf32, #tpu.memory_space<vmem>>) attributes {dimension_semantics = [#tpu.dimension_semantics<parallel>, #tpu.dimension_semantics<arbitrary>], iteration_bounds = array<i64: 2, 2>, scalar_prefetch = 0 : i64, scratch_operands = 1 : i64, tpu.core_type = #tpu.core_type<tc>, window_params = [{transform_indices = @transform_0, window_bounds = array<i64: 8, 32>}, {transform_indices = @transform_1, window_bounds = array<i64: 1, 8, 8>}, {transform_indices = @transform_2, window_bounds = array<i64: 1, 32, 32>}, {transform_indices = @transform_3, window_bounds = array<i64: 1, 1, 32>}, {transform_indices = @transform_4, window_bounds = array<i64: 1, 1, 32>}, {transform_indices = @transform_5, window_bounds = array<i64: 1, 1, 32>}, {transform_indices = @transform_6, window_bounds = array<i64: 8, 32>}]} {
    %c0_i32 = arith.constant 0 : i32
    %0 = arith.cmpi eq, %arg1, %c0_i32 : i32
    %1 = arith.extui %0 : i1 to i32
    %c0_i32_0 = arith.constant 0 : i32
    %2 = arith.cmpi ne, %1, %c0_i32_0 : i32
    scf.if %2 {
      %c0_27 = arith.constant 0 : index
      %c0_28 = arith.constant 0 : index
      %46 = vector.load %arg2[%c0_27, %c0_28] : memref<8x32xf32, #tpu.memory_space<vmem>>, vector<8x32xf32>
      %c0_29 = arith.constant 0 : index
      %c0_30 = arith.constant 0 : index
      %47 = vector.load %arg9[%c0_29, %c0_30] : memref<8x32xf32, #tpu.memory_space<vmem>>, vector<8x32xf32>
      tpu.vector_store %arg9[%c0_29, %c0_30], %46 {strides = array<i32>} : memref<8x32xf32, #tpu.memory_space<vmem>>, vector<8x32xf32>,
    } else {
    }
    %c0 = arith.constant 0 : index
    %c0_1 = arith.constant 0 : index
    %3 = vector.load %arg9[%c0, %c0_1] : memref<8x32xf32, #tpu.memory_space<vmem>>, vector<8x32xf32>
    %c0_2 = arith.constant 0 : index
    %c0_3 = arith.constant 0 : index
    %c0_4 = arith.constant 0 : index
    %4 = vector.load %arg4[%c0_2, %c0_3, %c0_4] : memref<1x32x32xf32, #tpu.memory_space<vmem>>, vector<1x32x32xf32>
    %5 = vector.shape_cast %4 : vector<1x32x32xf32> to vector<32x32xf32>
    %c0_5 = arith.constant 0 : index
    %c0_6 = arith.constant 0 : index
    %c0_7 = arith.constant 0 : index
    %6 = vector.load %arg5[%c0_5, %c0_6, %c0_7] : memref<1x1x32xf32, #tpu.memory_space<vmem>>, vector<1x1x32xf32>
    %7 = vector.shape_cast %6 : vector<1x1x32xf32> to vector<1x32xf32>
    %c0_8 = arith.constant 0 : index
    %c0_9 = arith.constant 0 : index
    %c0_10 = arith.constant 0 : index
    %8 = vector.load %arg6[%c0_8, %c0_9, %c0_10] : memref<1x1x32xf32, #tpu.memory_space<vmem>>, vector<1x1x32xf32>
    %9 = vector.shape_cast %8 : vector<1x1x32xf32> to vector<1x32xf32>
    %c0_11 = arith.constant 0 : index
    %c0_12 = arith.constant 0 : index
    %c0_13 = arith.constant 0 : index
    %10 = vector.load %arg7[%c0_11, %c0_12, %c0_13] : memref<1x1x32xf32, #tpu.memory_space<vmem>>, vector<1x1x32xf32>
    %11 = vector.shape_cast %10 : vector<1x1x32xf32> to vector<1x32xf32>
    %cst = arith.constant dense<0.000000e+00> : vector<8x32xf32>
    %12 = tpu.matmul %3, %5, %cst {dimension_numbers = #tpu.dot_dimension_numbers<[1], [0], [0], [1], [0, 0, 1, 1], [], []>} : vector<8x32xf32>, vector<32x32xf32>, vector<8x32xf32> -> vector<8x32xf32>
    %13 = vector.broadcast %7 : vector<1x32xf32> to vector<8x32xf32>
    %14 = arith.addf %12, %13 : vector<8x32xf32>
    %15 = vector.shape_cast %14 : vector<8x32xf32> to vector<1x8x32xf32>
    %c0_14 = arith.constant 0 : index
    %c0_15 = arith.constant 0 : index
    %c0_16 = arith.constant 0 : index
    %16 = vector.load %arg3[%c0_14, %c0_15, %c0_16] : memref<1x8x8xf32, #tpu.memory_space<vmem>>, vector<1x8x8xf32>
    "tpu.trace_start"() <{level = 10 : i32, message = "bst,bth->bsh"}> : () -> ()
    %cst_17 = arith.constant dense<0.000000e+00> : vector<1x8x32xf32>
    %17 = tpu.matmul %16, %15, %cst_17 {dimension_numbers = #tpu.dot_dimension_numbers<[2], [1], [1], [2], [0, 0, 0, 1, 1, 2], [0], [0]>} : vector<1x8x8xf32>, vector<1x8x32xf32>, vector<1x8x32xf32> -> vector<1x8x32xf32>
    "tpu.trace_stop"() : () -> ()
    %18 = vector.shape_cast %17 : vector<1x8x32xf32> to vector<8x32xf32>
    %cst_18 = arith.constant dense<0.000000e+00> : vector<8xf32>
    %19 = vector.multi_reduction <add>, %18, %cst_18 [1] : vector<8x32xf32> to vector<8xf32>
    %20 = vector.shape_cast %19 : vector<8xf32> to vector<8x1xf32>
    %cst_19 = arith.constant 3.200000e+01 : f32
    %21 = vector.broadcast %cst_19 : f32 to vector<8x1xf32>
    %22 = arith.divf %20, %21 : vector<8x1xf32>
    %23 = vector.broadcast %22 : vector<8x1xf32> to vector<8x32xf32>
    %24 = arith.subf %18, %23 : vector<8x32xf32>
    %25 = arith.mulf %24, %24 : vector<8x32xf32>
    %cst_20 = arith.constant dense<0.000000e+00> : vector<8xf32>
    %26 = vector.multi_reduction <add>, %25, %cst_20 [1] : vector<8x32xf32> to vector<8xf32>
    %27 = vector.shape_cast %26 : vector<8xf32> to vector<8x1xf32>
    %cst_21 = arith.constant 0.0322580636 : f32
    %28 = vector.broadcast %cst_21 : f32 to vector<8x1xf32>
    %29 = arith.mulf %27, %28 : vector<8x1xf32>
    %30 = math.sqrt %29 : vector<8x1xf32>
    %cst_22 = arith.constant 1.000000e-03 : f32
    %31 = vector.broadcast %cst_22 : f32 to vector<8x1xf32>
    %32 = arith.addf %30, %31 : vector<8x1xf32>
    %33 = tpu.reciprocal %32 : vector<8x1xf32> -> vector<8x1xf32>
    %34 = vector.broadcast %33 : vector<8x1xf32> to vector<8x32xf32>
    %35 = arith.mulf %24, %34 : vector<8x32xf32>
    %36 = vector.broadcast %9 : vector<1x32xf32> to vector<8x32xf32>
    %37 = arith.mulf %35, %36 : vector<8x32xf32>
    %38 = vector.broadcast %11 : vector<1x32xf32> to vector<8x32xf32>
    %39 = arith.addf %37, %38 : vector<8x32xf32>
    %cst_23 = arith.constant 0.000000e+00 : f32
    %40 = vector.broadcast %cst_23 : f32 to vector<8x32xf32>
    %41 = arith.maximumf %39, %40 : vector<8x32xf32>
    %c0_24 = arith.constant 0 : index
    %c0_25 = arith.constant 0 : index
    %42 = vector.load %arg9[%c0_24, %c0_25] : memref<8x32xf32, #tpu.memory_space<vmem>>, vector<8x32xf32>
    tpu.vector_store %arg9[%c0_24, %c0_25], %41 {strides = array<i32>} : memref<8x32xf32, #tpu.memory_space<vmem>>, vector<8x32xf32>,
    %c1_i32 = arith.constant 1 : i32
    %43 = arith.cmpi eq, %arg1, %c1_i32 : i32
    %44 = arith.extui %43 : i1 to i32
    %c0_i32_26 = arith.constant 0 : i32
    %45 = arith.cmpi ne, %44, %c0_i32_26 : i32
    scf.if %45 {
      %c0_27 = arith.constant 0 : index
      %c0_28 = arith.constant 0 : index
      %46 = vector.load %arg9[%c0_27, %c0_28] : memref<8x32xf32, #tpu.memory_space<vmem>>, vector<8x32xf32>
      %c0_29 = arith.constant 0 : index
      %c0_30 = arith.constant 0 : index
      %47 = vector.load %arg8[%c0_29, %c0_30] : memref<8x32xf32, #tpu.memory_space<vmem>>, vector<8x32xf32>
      tpu.vector_store %arg8[%c0_29, %c0_30], %46 {strides = array<i32>} : memref<8x32xf32, #tpu.memory_space<vmem>>, vector<8x32xf32>,
    } else {
    }
    return
  }
  func.func @transform_0(%arg0: i32, %arg1: i32) -> (i32, i32) {
    %c0_i32 = arith.constant 0 : i32
    %c0_i32_0 = arith.constant 0 : i32
    return %arg0, %c0_i32 : i32, i32
  }
  func.func @transform_1(%arg0: i32, %arg1: i32) -> (i32, i32, i32) {
    %c0_i32 = arith.constant 0 : i32
    %c0_i32_0 = arith.constant 0 : i32
    %c0_i32_1 = arith.constant 0 : i32
    return %arg0, %c0_i32, %c0_i32_0 : i32, i32, i32
  }
  func.func @transform_2(%arg0: i32, %arg1: i32) -> (i32, i32, i32) {
    %c0_i32 = arith.constant 0 : i32
    %c0_i32_0 = arith.constant 0 : i32
    %c0_i32_1 = arith.constant 0 : i32
    return %arg1, %c0_i32, %c0_i32_0 : i32, i32, i32
  }
  func.func @transform_3(%arg0: i32, %arg1: i32) -> (i32, i32, i32) {
    %c0_i32 = arith.constant 0 : i32
    %c0_i32_0 = arith.constant 0 : i32
    %c0_i32_1 = arith.constant 0 : i32
    return %arg1, %c0_i32, %c0_i32_0 : i32, i32, i32
  }
  func.func @transform_4(%arg0: i32, %arg1: i32) -> (i32, i32, i32) {
    %c0_i32 = arith.constant 0 : i32
    %c0_i32_0 = arith.constant 0 : i32
    %c0_i32_1 = arith.constant 0 : i32
    return %arg1, %c0_i32, %c0_i32_0 : i32, i32, i32
  }
  func.func @transform_5(%arg0: i32, %arg1: i32) -> (i32, i32, i32) {
    %c0_i32 = arith.constant 0 : i32
    %c0_i32_0 = arith.constant 0 : i32
    %c0_i32_1 = arith.constant 0 : i32
    return %arg1, %c0_i32, %c0_i32_0 : i32, i32, i32
  }
  func.func @transform_6(%arg0: i32, %arg1: i32) -> (i32, i32) {
    %c0_i32 = arith.constant 0 : i32
    %c0_i32_0 = arith.constant 0 : i32
    return %arg0, %c0_i32 : i32, i32
  }
}

</mosaic_0001>

<bundles_post_ra>
// kernel: tpu_custom_call.1
= control target key start
LH: loop header
LB: loop body
LE: loop exit
PB: predicated region body
PF: predicated region fallthrough
CT: control target
= control target key end

     0   :  { %s1476_s0 = inlined_call_operand.hbm [shape: f32[16,32], index: 0, kind: input, shape index: {}]   ;;  %s1477_s1 = inlined_call_operand.hbm [shape: f32[2,8,8], index: 1, kind: input, shape index: {}]   ;;  %s1478_s2 = inlined_call_operand.hbm [shape: f32[2,32,32], index: 2, kind: input, shape index: {}]   ;;  %s1479_s3 = inlined_call_operand.vmem [shape: f32[2,1,32], index: 3, kind: input, shape index: {}]   ;;  %s1480_s4 = inlined_call_operand.hbm [shape: f32[2,1,32], index: 4, kind: input, shape index: {}]   ;;  %s1481_s5 = inlined_call_operand.vmem [shape: f32[2,1,32], index: 5, kind: input, shape index: {}]   ;;  %s1482_s6 = inlined_call_operand.hbm [shape: f32[16,32], index: 6, kind: output, shape index: {}]  }
   0x1   :  { %1495 = sst [smem:[#allocation28_spill]] %s1477_s1 }
   0x2   :  { %1496 = sst [smem:[#allocation29_spill]] %s1479_s3 }
   0x3   :  { %1497 = sst [smem:[#allocation30_spill]] %s1481_s5 }
   0x4   :  { %1498 = sst [smem:[#allocation31_spill]] %s1482_s6 }
   0x5   :  { %11 = vsyncpa [#allocation4], 0 }
   0x6   :  { %13 = vsyncpa [#allocation4 + $0x1], 0 }
   0x7   :  { %14 = vsyncpa [#allocation7], 0 }
   0x8   :  { %16 = vsyncpa [#allocation7 + $0x1], 0 }
   0x9   :  { %17 = vsyncpa [#allocation10], 0 }
   0xa   :  { %19 = vsyncpa [#allocation10 + $0x1], 0 }
   0xb   :  { %20 = vsyncpa [#allocation5], 0 }
   0xc   :  { %22 = vsyncpa [#allocation5 + $0x1], 0  ;;  %s1175_s21 = smov 0   ;;  %s1177_s22 = smov 0  }
   0xd   :  { %s1179_s23 = smov 0   ;;  %s1181_s24 = smov 0  }
   0xe   :  { %s1183_s25 = smov 0   ;;  %s1185_s26 = smov 0  }
   0xf   :  { %s1187_s27 = smov 0   ;;  %s1189_s28 = smov 0  }
  0x10   :  { %s1191_s29 = smov 0   ;;  %s1193_s30 = smov 0  }
  0x11   :  { %s1195_s7 = smov 0  }
  0x12 LB: > { %1499 = sst [smem:[#allocation17_spill]] %s1107_s24  ;;  %s1231_s8 = sadd.s32 4294967295, %s1135_s7   ;;  %s1135_s7 = sphi %s1195_s7, %s28_s7   ;;  %s1131_s30 = sphi %s1193_s30, %s1535_s30   ;;  %s1127_s29 = sphi %s1191_s29, %s1542_s29   ;;  %s1123_s28 = sphi %s1189_s28, %s1533_s28   ;;  %s1119_s27 = sphi %s1187_s27, %s1541_s27   ;;  %s1115_s26 = sphi %s1185_s26, %s1532_s26   ;;  %s1111_s25 = sphi %s1183_s25, %s1540_s25   ;;  %s1107_s24 = sphi %s1181_s24, %s1539_s24   ;;  %s1103_s23 = sphi %s1179_s23, %s1538_s23   ;;  %s1099_s22 = sphi %s1177_s22, %s1537_s22   ;;  %s1095_s21 = sphi %s1175_s21, %s1536_s21  }
  0x13   : > { %1500 = sst [smem:[#allocation18_spill]] %s1115_s26  ;;  %s728_s9 = sadd.s32 4294967294, %s1135_s7  }
  0x14   : > { %1501 = sst [smem:[#allocation19_spill]] %s1123_s28  ;;  %s37_s10 = sadd.s32 1, %s1127_s29 }
  0x15   : > { %1502 = sst [smem:[#allocation20_spill]] %s1131_s30  ;;  %s40_s11 = sadd.s32 1, %s1131_s30 }
  0x16   : > { %1503 = sst [smem:[#allocation21_spill]] %s1135_s7  ;;  %p38_p0 = scmp.ge.s32.totalorder %s37_s10, 2 }
  0x17   : > { %s47_s12 = sadd.s32 1, %s1115_s26  ;;  %p54_p1 = scmp.ne.s32.totalorder %s1115_s26, %s1111_s25 }
  0x18   : > { %p55_p2 = scmp.eq.s32.totalorder %s1135_s7, 0  ;;  %s1544_s10 = smov (%p38_p0, %s37_s10), 0 }
  0x19   : > { %1504 = sst [smem:[#allocation22_spill]] %s1544_s10  ;;  %s1546_s11 = smov (!%p38_p0, %s40_s11), %s1131_s30 }
  0x1a   : > { %p1248_p3 = por %p55_p2, %p54_p1  ;;  %p1484_p4 = scmp.ne.s32.totalorder %s1111_s25, %s1107_s24 }
  0x1b   : > { %p42_p5 = scmp.ge.s32.totalorder %s1546_s11, 2  ;;  %p61_p6 = scmp.eq.s32.totalorder %s1231_s8, 0 }
  0x1c   : > { %s96_s14 = ssub.s32 %s1127_s29, %s1544_s10  ;;  %s99_s15 = sadd.s32 1, %s1103_s23 }
  0x1d   : > { %s1548_s11 = smov (%p42_p5, %s1546_s11), 0  ;;  %p1265_p7 = por %p61_p6, %p1484_p4 }
  0x1e   : > { %1506 = sst [smem:[#allocation23_spill]] %s1548_s11  ;;  %p97_p8 = scmp.eq.s32.totalorder %s96_s14, 0 }
  0x1f   : > { %s44_s17 = ssub.s32 %s1131_s30, %s1548_s11  ;;  %p106_p9 = scmp.ne.s32.totalorder %s1103_s23, %s1099_s22 }
  0x20   : > { %p45_p10 = scmp.eq.s32.totalorder %s44_s17, 0  ;;  %p112_p11 = scmp.ne.s32.totalorder %s1099_s22, %s1095_s21 }
  0x21   : > { %s1276_s18 = scalar_select %p97_p8, %s1103_s23, %s99_s15  }
  0x22   : > { %s1279_s19 = scalar_select %p45_p10, %s1115_s26, %s47_s12  }
  0x23   : > { %1508 = sst [smem:[#allocation24_spill]] %s1276_s18  ;;  %p1283_p12 = por %p106_p9, %p55_p2 }
  0x24   : > { %1509 = sst [smem:[#allocation25_spill]] %s1279_s19  ;;  %p1289_p13 = por %p112_p11, %p61_p6 }
  0x25   : > { %p214_p0 = scmp.eq.s32.totalorder %s1231_s8, 3  ;;  %p220_p5 = scmp.eq.s32.totalorder %s728_s9, 3 }
  0x26   : > { %p779_p4 = scmp.lt.s32.totalorder %s1135_s7, 4  ;;  %p1514_p10 = scmp.ne.s32.totalorder %s1111_s25, %s1107_s24 }
  0x27   : > { %p1298_p8 = por %p214_p0, %p54_p1  ;;  %s240_s14 = sand.u32 1, %s1115_s26  }
  0x28   : > { %p1305_p2 = por %p220_p5, %p1514_p10  ;;  %s732_s15 = sshll.u32 %s1131_s30, 3 }
  0x29   : > { %s1512_s21 = scalar_select %p1298_p8, 1, 0 }
  0x2a   : > { %s1515_s12 = scalar_select %p1305_p2, 1, 0 }
  0x2b   : > { %1513 = sst [smem:[#allocation26_spill]] %s1512_s21  ;;  %s731_s17 = sshll.u32 %s240_s14, 3 }
  0x2c   : > { %1516 = sst [smem:[#allocation27_spill]] %s1515_s12  ;;  %p1315_p6 = pnand %p779_p4, %p1248_p3 }
  0x2d   : > { %s259_s11 = sand.u32 1, %s1135_s7   ;;  %s1518_s1 = sld [smem:[#allocation28_spill]] }
  0x2e   : > { %s263_s6 = scalar_lea.vmem [#allocation6], %s731_s17  ;;  %p1327_p1 = pnand %p779_p4, %p1283_p12 }
  0x2f   : > { %s271_s21 = sshll.u32 %s263_s6, 4  ;;  %s260_s30 = scalar_lea.sflag [#allocation7], %s259_s11  ;;  %s272_s21 = int_to_ptr.vmem [resolvable:$true] %s271_s21 }
  0x30   : > { %p738_p3 = scmp.ge.s32.totalorder %s1135_s7, 1  ;;  %p327_p9 = scmp.lt.s32.totalorder %s1135_s7, 5 }
  0x31   : > { %s248_s19 = scalar_lea.hbm %s1476_s0, %s732_s15  ;;  %s244_s20 = scalar_lea.vmem [#allocation3], %s731_s17 }
  0x32   : > { %p1335_p11 = pnand %p738_p3, %p327_p9  ;;  %s250_s26 = sshll.u32 %s248_s19, 4  ;;  %s251_s26 = int_to_ptr.hbm [resolvable:$true] %s250_s26 }
  0x33   : > { %s267_s24 = scalar_lea.hbm %s1518_s1, %s732_s15  ;;  %s252_s1 = sshll.u32 %s244_s20, 4  ;;  %s253_s1 = int_to_ptr.vmem [resolvable:$true] %s252_s1 }
  0x34   : > { %s269_s12 = sshll.u32 %s267_s24, 4  ;;  %s280_s11 = sand.u32 1, %s1103_s23   ;;  %s270_s12 = int_to_ptr.hbm [resolvable:$true] %s269_s12 }
  0x35   : > { %768 = dma.hbm_to_vmem [thread:$0]  (!%p1315_p6), %s270_s12, 128, %s272_s21, %s260_s30  }
  0x36   : > { %s241_s28 = scalar_lea.sflag [#allocation4], %s240_s14  ;;  %s735_s21 = sshll.u32 %s280_s11, 5 }
  0x37   : > { %765 = dma.hbm_to_vmem [thread:$0]  (!%p1315_p6), %s251_s26, 128, %s253_s1, %s241_s28  }
  0x38   : > { %s751_s12 = sshll.u32 %s1127_s29, 5  ;;  %s282_s15 = scalar_lea.vmem [#allocation8], %s735_s21 }
  0x39   : > { %s287_s3 = scalar_lea.hbm %s1478_s2, %s751_s12  ;;  %s290_s17 = sshll.u32 %s282_s15, 4  ;;  %s291_s17 = int_to_ptr.vmem [resolvable:$true] %s290_s17 }
  0x3a   : > { %s288_s6 = sshll.u32 %s287_s3, 4  ;;  %s1137_s24 = smov 128   ;;  %s289_s6 = int_to_ptr.hbm [resolvable:$true] %s288_s6 }
  0x3b   : > { %s1138_s19 = smov 8   ;;  %s312_s1 = scalar_lea.hbm %s1480_s4, %s1127_s29 }
  0x3c   : > { %771 = dma.hbm_to_vmem [thread:$0]  (!%p1327_p1), %s289_s6, 512, %s291_s17, %s260_s30, %s1137_s24, %s1137_s24, %s1138_s19  }
  0x3d   : > { %s309_s26 = scalar_lea.vmem [#allocation9], %s280_s11  ;;  %s314_s9 = sshll.u32 %s312_s1, 4  ;;  %s315_s9 = int_to_ptr.hbm [resolvable:$true] %s314_s9 }
  0x3e   : > { %s316_s28 = sshll.u32 %s309_s26, 4  ;;  %s307_s5 = scalar_lea.sflag [#allocation10], %s280_s11  ;;  %s317_s28 = int_to_ptr.vmem [resolvable:$true] %s316_s28 }
  0x3f   : > { %774 = dma.hbm_to_vmem [thread:$0]  (!%p1327_p1), %s315_s9, 16, %s317_s28, %s307_s5  }
  0x40   : > { %331 = sbr.rel (%p1335_p11) target bundleno = 674 (0x2a2), region = 44  ;;  %s1360_s3 = sand.u32 (!%p1335_p11), 1, %s1111_s25  }
  0x41   : > { %s1363_s30 = sshll.u32 (!%p1335_p11), %s1360_s3, 3  ;;  %s334_s7 = scalar_lea.sflag (!%p1335_p11), [#allocation4], %s1360_s3 }
  0x42   : > { %s337_s21 = scalar_lea.vmem (!%p1335_p11), [#allocation3], %s1363_s30 }
  0x45   : > { %1074 = dma.done.wait (%p1265_p7), %s334_s7, 128  }
  0x46   : > { %1076 = vsyncadd (%p1265_p7), %s334_s7, 4294967168  ;;  %s343_s13 = sand.u32 1, %s1231_s8   ;;  %s347_s11 = scalar_lea.vmem [#allocation6], %s1363_s30 }
  0x47   : > { %s344_s18 = scalar_lea.sflag [#allocation7], %s343_s13 }
  0x48   : > { %1078 = dma.done.wait (%p1265_p7), %s344_s18, 128  }
  0x49   : > { %1080 = vsyncadd (%p1265_p7), %s344_s18, 4294967168  ;;  %s1378_s12 = sand.u32 1, %s1099_s22  }
  0x4a   : > { %s741_s6 = sshll.u32 %s1378_s12, 5 }
  0x4b   : > { %s357_s15 = scalar_lea.vmem [#allocation8], %s741_s6 }
  0x4c   : > { %1082 = dma.done.wait (%p1289_p13), %s344_s18, 512  }
  0x4d   : > { %1084 = vsyncadd (%p1289_p13), %s344_s18, 4294966784  ;;  %s364_s8 = scalar_lea.sflag [#allocation10], %s1378_s12  ;;  %s366_s17 = scalar_lea.vmem [#allocation9], %s1378_s12 }
  0x4e   : > { %1086 = dma.done.wait (%p1289_p13), %s364_s8, 16  }
  0x4f   : > { %1088 = vsyncadd (%p1289_p13), %s364_s8, 4294967280  ;;  %p416_p4 = scmp.lt.s32.totalorder %s1119_s27, 1  ;;  %s1521_s20 = sld [smem:[#allocation29_spill]] }
  0x50   : > { %s1522_s28 = sld [smem:[#allocation30_spill]]  ;;  %s415_s5 = scalar_lea.vmem [#allocation11], %s1363_s30 }
  0x51   : > { %s1393_s16 = scalar_select %p416_p4, %s1119_s27, 1 }
  0x52   : > { %p743_p7 = scmp.ne.s32.totalorder %s1119_s27, 0 }
  0x54   : > { %425 = sbr.rel (%p743_p7) target bundleno = 91 (0x5b), region = 64 }
  0x55   : > { %s418_s14 = scalar_lea.vmem %s1521_s20, %s1393_s16 }
  0x56   : > { %s421_s9 = scalar_lea.vmem %s1522_s28, %s1393_s16 }
  0x59   : > { %v426_v0 = vld [vmem:[%s337_s21] sm:$0xff]  ;;  %vm427_vm0 = vcmask 261120  }
  0x5a   : > { %428 = vst.msk [vmem:[#allocation2] sm:$0xff] %vm427_vm0, %v426_v0 }
  0x5b PF: > { %v433_v1 = vld [vmem:[%s357_s15 + $0x18] sm:$0xff]  ;;  %v432_v2 = vld [vmem:[%s357_s15 + $0x10] sm:$0xff]  ;;  %v431_v3 = vld [vmem:[%s357_s15 + $0x8] sm:$0xff]  ;;  %vm440_vm1 = vcmask 261120   ;;  %vm465_vm2 = vcmask 64512   ;;  %v1139_v12 = vmov 32.0  }
  0x5c   : > { %456 = vmatpush.msra.mxu0 %v433_v1  ;;  %v430_v4 = vld [vmem:[%s357_s15] sm:$0xff]  ;;  %v872_v6 = vld [vmem:[%s418_s14] ss:$0 sm:$0xff]  ;;  %875 = vrcp.f32 %v1139_v12  ;;  %p746_p12 = scmp.ne.s32.totalorder %s1119_s27, 1 }
  0x5d   : > { %v464_v9 = vld [vmem:[%s347_s11] sm:$0xff] }
  0x5e   : > { %457 = vmatpush.msra.mxu0 %v432_v2  ;;  %v873_v45 = vld [vmem:[%s366_s17] ss:$0 sm:$0xff] }
  0x5f   : > { %v874_v48 = vld [vmem:[%s421_s9] ss:$0 sm:$0xff] }
  0x60   : > { %458 = vmatpush.msra.mxu0 %v431_v3 }
  0x61   : > { %v429_v5 = vld [vmem:[#allocation2] sm:$0xff] }
  0x62   : > { %459 = vmatpush.msra.mxu0 %v430_v4  ;;  %v876_v13 = vpop.eup %875 }
  0x63   : > { %744 = vmatmul.msk.f32.vlgmr.msra.gmra.mxu0 %vm440_vm1, %v429_v5  ;;  %v493_v14 = vmul.f32 32.0, %v876_v13  ;;  %vm497_vm3 = vweird.f32 %v876_v13 }
  0x65   : > { %v494_v15 = vsub.f32 1.0, %v493_v14 }
  0x67   : > { %v495_v16 = vmul.f32 %v876_v13, %v494_v15 }
  0x69   : > { %v496_v17 = vadd.f32 %v876_v13, %v495_v16 }
  0x6b   : > { %v498_v18 = vsel %vm497_vm3, %v876_v13, %v496_v17 }
  0xe0   : > { %v461_v7 = vpop.f32.mrf.mxu0 }
  0xe1   : > { %v462_v8 = vadd.f32 %v872_v6, %v461_v7 }
  0xe3   : > { %484 = vmatpush.msra.mxu1 %v462_v8 }
  0xe4   : > { %745 = vmatmul.msk.f32.vlgmr.msra.gmra.mxu1 %vm465_vm2, %v464_v9 }
 0x161   : > { %v486_v10 = vpop.f32.mrf.mxu1 }
 0x162   : > { %v489_v11 = vsel %vm440_vm1, %v486_v10, 0.0 }
 0x163   : > { %490 = vadd.xlane.f32.xlu0 %v489_v11 }
 0x1d6   : > { %v491_v19 = vpop.xlane.xlu0 %490 }
 0x1d7   : > { %v499_v20 = vmul.f32 %v498_v18, %v491_v19 }
 0x1d9   : > { %v500_v21 = vsub.f32 %v486_v10, %v499_v20 }
 0x1db   : > { %v501_v22 = vmul.f32 %v500_v21, %v500_v21 }
 0x1dd   : > { %v502_v23 = vsel %vm440_vm1, %v501_v22, 0.0 }
 0x1de   : > { %503 = vadd.xlane.f32.xlu0 %v502_v23 }
 0x251   : > { %v504_v24 = vpop.xlane.xlu0 %503 }
 0x252   : > { %v505_v25 = vmul.f32 0.032258064, %v504_v24 }
 0x254   : > { %877 = vrsqrt.f32 %v505_v25  ;;  %vm513_vm4 = vcmp.eq.f32.partialorder %v505_v25, inf  ;;  %v516_v33 = vand.u32 2147483648, %v505_v25  ;;  %vm515_vm5 = vcmp.eq.f32.partialorder %v505_v25, 0.0 }
 0x25a   : > { %v878_v26 = vpop.eup %877 }
 0x25b   : > { %v507_v27 = vmul.f32 %v878_v26, %v505_v25 }
 0x25d   : > { %v508_v28 = vmul.f32 %v878_v26, %v507_v27 }
 0x25f   : > { %v509_v29 = vmul.f32 0.5, %v508_v28 }
 0x261   : > { %v510_v30 = vsub.f32 1.5, %v509_v29 }
 0x263   : > { %v511_v31 = vmul.f32 %v878_v26, %v510_v30 }
 0x265   : > { %v512_v32 = vmul.f32 %v511_v31, %v505_v25 }
 0x267   : > { %v514_v34 = vsel %vm513_vm4, %v505_v25, %v512_v32 }
 0x268   : > { %v517_v35 = vsel %vm515_vm5, %v516_v33, %v514_v34 }
 0x269   : > { %v518_v36 = vadd.f32 0.001, %v517_v35 }
 0x26b   : > { %879 = vrcp.f32 %v518_v36  ;;  %v530_v40 = vand.u32 2147483648, %v518_v36  ;;  %v528_v42 = vand.u32 2147483647, %v518_v36  ;;  %vm524_vm7 = vweird.f32 %v518_v36 }
 0x26d   : > { %v531_v44 = vor.u32 1.1754944e-38, %v530_v40  ;;  %vm529_vm9 = vcmp.eq.f32.partialorder %v528_v42, 8.507059e+37 }
 0x271   : > { %v880_v37 = vpop.eup %879 }
 0x272   : > { %v520_v38 = vmul.f32 %v880_v37, %v518_v36  ;;  %vm525_vm6 = vweird.f32 %v880_v37 }
 0x273   : > { %vm526_vm8 = vmor %vm524_vm7, %vm525_vm6 }
 0x274   : > { %v521_v39 = vsub.f32 1.0, %v520_v38 }
 0x276   : > { %v522_v41 = vmul.f32 %v880_v37, %v521_v39 }
 0x278   : > { %v523_v43 = vadd.f32 %v880_v37, %v522_v41 }
 0x27a   : > { %v527_v46 = vsel %vm526_vm8, %v880_v37, %v523_v43 }
 0x27b   : > { %v532_v47 = vsel %vm529_vm9, %v531_v44, %v527_v46 }
 0x27c   : > { %v533_v49 = vmul.f32 %v532_v47, %v500_v21 }
 0x27e   : > { %v537_v50 = vmul.f32 %v873_v45, %v533_v49 }
 0x280   : > { %v541_v51 = vadd.f32 %v874_v48, %v537_v50  ;;  %547 = sbr.rel (%p746_p12) target bundleno = 653 (0x28d), region = 68 }
 0x282   : > { %v542_v52 = vmax.f32 %v541_v51, 0.0 }
 0x284   : > { %543 = vst.msk [vmem:[#allocation2] sm:$0xff] %vm440_vm1, %v542_v52 }
 0x28b   : > { %v548_v53 = vld [vmem:[#allocation2] sm:$0xff] }
 0x28c   : > { %549 = vst.msk [vmem:[%s415_s5] sm:$0xff] %vm440_vm1, %v548_v53 }
 0x28d PF: > { %s1524_s13 = sld [smem:[#allocation19_spill]]  ;;  %s563_s17 = sshll.u32 %s415_s5, 4  ;;  %s564_s17 = int_to_ptr.vmem [resolvable:$true] %s563_s17 }
 0x28e   : > { %s1526_s15 = sld [smem:[#allocation31_spill]]  ;;  %s551_s16 = scalar_lea.sflag [#allocation5], %s1360_s3 }
 0x293   : > { %s748_s11 = sshll.u32 %s1524_s13, 3 }
 0x294   : > { %s561_s8 = scalar_lea.hbm %s1526_s15, %s748_s11  ;;  %s1021_s1 = scalar_lea.hbm %s1526_s15, 16 }
 0x295   : > { %s565_s27 = sshll.u32 %s561_s8, 4  ;;  %s566_s27 = int_to_ptr.hbm [resolvable:$true] %s565_s27 }
 0x296   : > { %s1015_s24 = sshra.s32 %s566_s27, 4  ;;  %s1016_s24 = int_to_ptr.hbm [resolvable:$true] %s1015_s24 }
 0x297   : > { %s1017_s19 = scalar_lea.hbm %s1016_s24, 8  ;;  %p1022_p10 = scmp.lt.s32.totalorder %s1016_s24, %s1526_s15 }
 0x298   : > { %p1018_p13 = scmp.ne.s32.totalorder %s1016_s24, %s1017_s19  ;;  %p1023_p6 = scmp.lt.s32.totalorder %s1021_s1, %s1017_s19 }
 0x29a   : > { %p1019_p0 = pnand %p1018_p13, %p1298_p8  ;;  %p1024_p1 = por %p1023_p6, %p1022_p10 }
 0x29c   : > { %p1020_p5 = pneg %p1019_p0 }
 0x29e   : > { %p1025_p3 = pnand %p1024_p1, %p1020_p5 }
 0x2a0   : > { %1028 = shalt.err (!%p1025_p3)
}
 0x2a1   : > { %760 = dma.vmem_to_hbm [thread:$0]  (%p1298_p8), %s564_s17, 128, %s566_s27, %s551_s16  }
 0x2a2 PF: > { %s1527_s3 = sld [smem:[#allocation21_spill]] }
 0x2a3   : > { %s1528_s30 = sld [smem:[#allocation17_spill]] }
 0x2a8   : > { %p780_p9 = scmp.ge.s32.totalorder %s1527_s3, 2 }
 0x2a9   : > { %s577_s5 = sand.u32 1, %s1528_s30  }
 0x2aa   : > { %p776_p11 = pnand %p780_p9, %p1305_p2  ;;  %s578_s10 = scalar_lea.sflag [#allocation5], %s577_s5 }
 0x2ac   : > { %p777_p4 = pneg %p776_p11 }
 0x2ae   : > { %1090 = dma.done.wait (%p777_p4), %s578_s10, 128  }
 0x2af   : > { %1092 = vsyncadd (%p777_p4), %s578_s10, 4294967168  ;;  %s28_s7 = sadd.s32 1, %s1527_s3   ;;  %s1530_s13 = sld [smem:[#allocation24_spill]] }
 0x2b0   : > { %p25_p7 = scmp.ge.s32.totalorder %s28_s7, 6   ;;  %s1531_s18 = sld [smem:[#allocation18_spill]] }
 0x2b1   : > { %s1532_s26 = sld [smem:[#allocation25_spill]]  ;;  %s1536_s21 = smov %s1099_s22 }
 0x2b2   : > { %s1533_s28 = sld [smem:[#allocation20_spill]]  ;;  %s1537_s22 = smov %s1103_s23 }
 0x2b3   : > { %s1534_s11 = sld [smem:[#allocation22_spill]]  ;;  %s1539_s24 = smov %s1111_s25 }
 0x2b4   : > { %s1535_s30 = sld [smem:[#allocation23_spill]]  ;;  %s1541_s27 = smov %s1127_s29 }
 0x2b5   : > { %s1538_s23 = smov %s1530_s13  ;;  %27 = sbr.rel (!%p25_p7) target bundleno = 18 (0x12), region = 140 }
 0x2b6   : > { %s1540_s25 = smov %s1531_s18 }
 0x2b9   : > { %s1542_s29 = smov %s1534_s11 }
 0x2ba   :  { %584 = vsyncpa [#allocation4], 1 }
 0x2bb   :  { %586 = vsyncpa [#allocation4 + $0x1], 1 }
 0x2bc   :  { %587 = vsyncpa [#allocation7], 1 }
 0x2bd   :  { %589 = vsyncpa [#allocation7 + $0x1], 1 }
 0x2be   :  { %590 = vsyncpa [#allocation10], 1 }
 0x2bf   :  { %592 = vsyncpa [#allocation10 + $0x1], 1 }
 0x2c0   :  { %593 = vsyncpa [#allocation5], 1 }
 0x2c1   :  { %595 = vsyncpa [#allocation5 + $0x1], 1 }

</bundles_post_ra>
